<compile_context>
chip_gen: v6e
topology: v6e:2x2x1
jax: 0.10.0
libtpu: 0.0.40
codegen_flags: <defaults>
</compile_context>

<pallas_src>
import functools

import jax
import jax.numpy as jnp
from jax.experimental import pallas as pl
from jax.experimental.pallas import tpu as pltpu


def _label_smoothing_kernel(pred_ref, target_ref, weight_ref, out_ref, *,
                            smoothing: float, num_classes: int,
                            n_rows: int, tile_n: int, has_weight: bool):
    i = pl.program_id(0)

    pred = pred_ref[...].astype(jnp.float32)               # (tile_n, C)
    tn, c = pred.shape

    # --- log_softmax pieces along the class (lane) axis --------------------
    m = jnp.max(pred, axis=-1, keepdims=True)               # (tile_n, 1)
    shifted = pred - m
    lse = jnp.log(jnp.sum(jnp.exp(shifted), axis=-1, keepdims=True))

    # target one-hot via a (1, C) iota broadcast against (tile_n, 1) targets
    tgt = target_ref[...]                                    # (tile_n, 1) int32
    col = jax.lax.broadcasted_iota(jnp.int32, (1, c), 1)
    onehot = col == tgt                                      # (tile_n, C) bool

    if has_weight:
        w = weight_ref[...].astype(jnp.float32)              # (1, C)
        lw = (shifted - lse) * w                              # weighted log-probs
        row_sum = jnp.sum(lw, axis=-1, keepdims=True)                       # Σ_c w*logp
        tgt_val = jnp.sum(jnp.where(onehot, lw, 0.0), axis=-1, keepdims=True)  # w_t*logp_t
    else:
        # Σ_c logp = Σ_c shifted - C*lse ; logp_t = shifted_t - lse
        row_sum = jnp.sum(shifted, axis=-1, keepdims=True) - jnp.float32(num_classes) * lse
        tgt_val = jnp.sum(jnp.where(onehot, shifted, 0.0), axis=-1, keepdims=True) - lse

    confidence = 1.0 - smoothing
    smooth_val = smoothing / (num_classes - 1)
    per_row = smooth_val * row_sum + (confidence - smooth_val) * tgt_val     # (tile_n, 1)

    # mask the ragged rows of the last tile (they read unspecified HBM/VMEM)
    row = jax.lax.broadcasted_iota(jnp.int32, (tn, 1), 0) + i * tile_n
    per_row = jnp.where(row < n_rows, per_row, 0.0)

    # per-tile partial sum, written into row 0 of a tiny (8, 1) output block
    partial = jnp.sum(per_row, keepdims=True)                # (1, 1)
    out_rows = jax.lax.broadcasted_iota(jnp.int32, (8, 1), 0)
    out_ref[...] = jnp.where(out_rows == 0, partial, 0.0)    # (8, 1)


def label_smoothing_loss(pred, target, *, classes, smoothing=0.0, weight=None,
                         tile_n=None):
    """pred: (N, C) float (f32 or bf16), target: (N,) int, weight: optional (C,)."""
    n, c = pred.shape
    assert c == classes
    assert 0.0 <= smoothing < 1.0
    assert classes > 1, "smoothing/(classes-1) requires classes > 1"

    has_weight = weight is not None
    if weight is None:
        weight2d = jnp.ones((1, c), dtype=jnp.float32)       # unused by kernel
    else:
        weight2d = weight.reshape(1, c).astype(jnp.float32)

    itemsize = jnp.dtype(pred.dtype).itemsize
    sub = 16 if itemsize < 4 else 8                           # sublane multiple

    # ---- generation-aware VMEM sizing ---------------------------------------
    try:
        info = pltpu.get_tpu_info()
        vmem_cap = int(getattr(info, "vmem_capacity_bytes", 64 << 20))
    except Exception:
        vmem_cap = 64 << 20                                   # conservative (v7x)

    if tile_n is None:
        # double-buffered input tile + ~6 live f32 temporaries, within ~half VMEM
        per_row_bytes = c * (2 * itemsize + 6 * 4)
        tile_n = (vmem_cap // 2) // max(per_row_bytes, 1)
        tile_n = max(sub, min(4096, tile_n))
    tile_n = max(sub, (tile_n // sub) * sub)
    tile_n = min(tile_n, pl.cdiv(n, sub) * sub)               # don't exceed rows

    num_tiles = pl.cdiv(n, tile_n)
    target2d = target.reshape(n, 1).astype(jnp.int32)

    vmem_limit = int(min(max(vmem_cap * 3 // 4, 32 << 20), 112 << 20))

    kernel = functools.partial(_label_smoothing_kernel,
                               smoothing=float(smoothing),
                               num_classes=int(classes),
                               n_rows=int(n),
                               tile_n=int(tile_n),
                               has_weight=has_weight)

    partials = pl.pallas_call(
        kernel,
        out_shape=jax.ShapeDtypeStruct((num_tiles * 8, 1), jnp.float32),
        grid=(num_tiles,),
        in_specs=[
            pl.BlockSpec((tile_n, c), lambda i: (i, 0)),      # pred tile (no padding)
            pl.BlockSpec((tile_n, 1), lambda i: (i, 0)),      # target tile
            pl.BlockSpec((1, c), lambda i: (0, 0)),           # weight (shared)
        ],
        out_specs=pl.BlockSpec((8, 1), lambda i: (i, 0)),     # per-tile partial sum
        compiler_params=pltpu.CompilerParams(
            dimension_semantics=("parallel",),
            vmem_limit_bytes=vmem_limit,
        ),
    )(pred, target2d, weight2d)

    # fold the minus sign here; divide by the *global* N (mean over rows)
    return -jnp.sum(partials) / jnp.float32(n)


def _reference(pred, target, *, classes, smoothing, weight):
    logp = jax.nn.log_softmax(pred.astype(jnp.float32), axis=-1)
    if weight is not None:
        logp = logp * weight[None, :]
    confidence = 1.0 - smoothing
    smooth_val = smoothing / (classes - 1)
    true_dist = jnp.full_like(logp, smooth_val)
    true_dist = true_dist.at[jnp.arange(pred.shape[0]), target].set(confidence)
    return jnp.mean(jnp.sum(-true_dist * logp, axis=-1))


if __name__ == "__main__":
    key = jax.random.PRNGKey(0)
    k1, k2, k3, k4, k5 = jax.random.split(key, 5)

    # Case 1: weighted, batch=8, classes=32.
    N, C = 8, 32
    smoothing = 0.1
    pred = jax.random.normal(k1, (N, C), dtype=jnp.float32)
    target = jax.random.randint(k2, (N,), 0, C, dtype=jnp.int32)
    weight = 0.5 + jax.random.uniform(k3, (C,), dtype=jnp.float32)

    loss = label_smoothing_loss(pred, target, classes=C,
                                smoothing=smoothing, weight=weight)
    loss = jax.block_until_ready(loss)
    ref = _reference(pred, target, classes=C, smoothing=smoothing, weight=weight)
    assert jnp.allclose(loss, ref, atol=1e-5, rtol=1e-5), (loss, ref)

    # Case 2: unweighted, ragged rows and non-aligned classes (no padding anywhere).
    N2, C2 = 13, 37
    pred2 = jax.random.normal(k4, (N2, C2), dtype=jnp.float32)
    target2 = jax.random.randint(k5, (N2,), 0, C2, dtype=jnp.int32)

    loss2 = label_smoothing_loss(pred2, target2, classes=C2, smoothing=0.2)
    loss2 = jax.block_until_ready(loss2)
    ref2 = _reference(pred2, target2, classes=C2, smoothing=0.2, weight=None)
    assert jnp.allclose(loss2, ref2, atol=1e-5, rtol=1e-5), (loss2, ref2)

    print("KERNEL_OK")
</pallas_src>

<mosaic_0001>
module attributes {stable_mosaic.version = 11 : i64} {
  func.func @_label_smoothing_kernel(%arg0: i32, %arg1: memref<8x32xf32, #tpu.memory_space<vmem>>, %arg2: memref<8x1xi32, #tpu.memory_space<vmem>>, %arg3: memref<1x32xf32, #tpu.memory_space<vmem>>, %arg4: memref<8x1xf32, #tpu.memory_space<vmem>>) attributes {dimension_semantics = [#tpu.dimension_semantics<parallel>], iteration_bounds = array<i64: 1>, scalar_prefetch = 0 : i64, scratch_operands = 0 : i64, tpu.core_type = #tpu.core_type<tc>, window_params = [{transform_indices = @transform_0, window_bounds = array<i64: 8, 32>}, {transform_indices = @transform_1, window_bounds = array<i64: 8, 1>}, {pipeline_mode = #tpu.pipeline_mode<synchronous>, transform_indices = @transform_2, window_bounds = array<i64: 1, 32>}, {transform_indices = @transform_3, window_bounds = array<i64: 8, 1>}]} {
    %c0 = arith.constant 0 : index
    %c0_0 = arith.constant 0 : index
    %0 = vector.load %arg1[%c0, %c0_0] : memref<8x32xf32, #tpu.memory_space<vmem>>, vector<8x32xf32>
    %cst = arith.constant dense<0xFF800000> : vector<8xf32>
    %1 = vector.multi_reduction <maximumf>, %0, %cst [1] : vector<8x32xf32> to vector<8xf32>
    %2 = vector.shape_cast %1 : vector<8xf32> to vector<8x1xf32>
    %3 = vector.broadcast %2 : vector<8x1xf32> to vector<8x32xf32>
    %4 = arith.subf %0, %3 : vector<8x32xf32>
    %5 = math.exp %4 : vector<8x32xf32>
    %cst_1 = arith.constant dense<0.000000e+00> : vector<8xf32>
    %6 = vector.multi_reduction <add>, %5, %cst_1 [1] : vector<8x32xf32> to vector<8xf32>
    %7 = vector.shape_cast %6 : vector<8xf32> to vector<8x1xf32>
    %8 = math.log %7 : vector<8x1xf32>
    %c0_2 = arith.constant 0 : index
    %c0_3 = arith.constant 0 : index
    %9 = vector.load %arg2[%c0_2, %c0_3] : memref<8x1xi32, #tpu.memory_space<vmem>>, vector<8x1xi32>
    %10 = tpu.iota {dimensions = array<i32: 1>} : vector<1x32xi32>
    %11 = vector.broadcast %10 : vector<1x32xi32> to vector<8x32xi32>
    %12 = vector.broadcast %9 : vector<8x1xi32> to vector<8x32xi32>
    %13 = arith.cmpi eq, %11, %12 : vector<8x32xi32>
    %c0_4 = arith.constant 0 : index
    %c0_5 = arith.constant 0 : index
    %14 = vector.load %arg3[%c0_4, %c0_5] : memref<1x32xf32, #tpu.memory_space<vmem>>, vector<1x32xf32>
    %15 = vector.broadcast %8 : vector<8x1xf32> to vector<8x32xf32>
    %16 = arith.subf %4, %15 : vector<8x32xf32>
    %17 = vector.broadcast %14 : vector<1x32xf32> to vector<8x32xf32>
    %18 = arith.mulf %16, %17 : vector<8x32xf32>
    %cst_6 = arith.constant dense<0.000000e+00> : vector<8xf32>
    %19 = vector.multi_reduction <add>, %18, %cst_6 [1] : vector<8x32xf32> to vector<8xf32>
    %20 = vector.shape_cast %19 : vector<8xf32> to vector<8x1xf32>
    %cst_7 = arith.constant 0.000000e+00 : f32
    %21 = vector.broadcast %cst_7 : f32 to vector<8x32xf32>
    %22 = arith.select %13, %18, %21 : vector<8x32xi1>, vector<8x32xf32>
    %cst_8 = arith.constant dense<0.000000e+00> : vector<8xf32>
    %23 = vector.multi_reduction <add>, %22, %cst_8 [1] : vector<8x32xf32> to vector<8xf32>
    %24 = vector.shape_cast %23 : vector<8xf32> to vector<8x1xf32>
    %cst_9 = arith.constant 0.0032258064 : f32
    %25 = vector.broadcast %cst_9 : f32 to vector<8x1xf32>
    %26 = arith.mulf %25, %20 : vector<8x1xf32>
    %cst_10 = arith.constant 0.896774172 : f32
    %27 = vector.broadcast %cst_10 : f32 to vector<8x1xf32>
    %28 = arith.mulf %27, %24 : vector<8x1xf32>
    %29 = arith.addf %26, %28 : vector<8x1xf32>
    %30 = tpu.iota {dimensions = array<i32: 0>} : vector<8x1xi32>
    %c8_i32 = arith.constant 8 : i32
    %31 = arith.muli %arg0, %c8_i32 : i32
    %32 = vector.broadcast %31 : i32 to vector<8x1xi32>
    %33 = arith.addi %30, %32 : vector<8x1xi32>
    %c8_i32_11 = arith.constant 8 : i32
    %34 = vector.broadcast %c8_i32_11 : i32 to vector<8x1xi32>
    %35 = arith.cmpi slt, %33, %34 : vector<8x1xi32>
    %cst_12 = arith.constant 0.000000e+00 : f32
    %36 = vector.broadcast %cst_12 : f32 to vector<8x1xf32>
    %37 = arith.select %35, %29, %36 : vector<8x1xi1>, vector<8x1xf32>
    %38 = vector.shape_cast %37 : vector<8x1xf32> to vector<1x8x1xf32>
    %cst_13 = arith.constant dense<0.000000e+00> : vector<1xf32>
    %39 = vector.multi_reduction <add>, %38, %cst_13 [1, 2] : vector<1x8x1xf32> to vector<1xf32>
    %40 = vector.shape_cast %39 : vector<1xf32> to vector<1x1x1xf32>
    %41 = vector.extract %40[0, 0, 0] : f32 from vector<1x1x1xf32>
    %42 = vector.broadcast %41 : f32 to vector<1x1xf32>
    %43 = tpu.iota {dimensions = array<i32: 0>} : vector<8x1xi32>
    %c0_i32 = arith.constant 0 : i32
    %44 = vector.broadcast %c0_i32 : i32 to vector<8x1xi32>
    %45 = arith.cmpi eq, %43, %44 : vector<8x1xi32>
    %cst_14 = arith.constant 0.000000e+00 : f32
    %46 = vector.shape_cast %42 : vector<1x1xf32> to vector<1x1xf32>
    %47 = vector.broadcast %46 : vector<1x1xf32> to vector<8x1xf32>
    %48 = vector.broadcast %cst_14 : f32 to vector<8x1xf32>
    %49 = arith.select %45, %47, %48 : vector<8x1xi1>, vector<8x1xf32>
    %c0_15 = arith.constant 0 : index
    %c0_16 = arith.constant 0 : index
    %50 = vector.load %arg4[%c0_15, %c0_16] : memref<8x1xf32, #tpu.memory_space<vmem>>, vector<8x1xf32>
    tpu.vector_store %arg4[%c0_15, %c0_16], %49 {strides = array<i32>} : memref<8x1xf32, #tpu.memory_space<vmem>>, vector<8x1xf32>,
    return
  }
  func.func @transform_0(%arg0: i32) -> (i32, i32) {
    %c0_i32 = arith.constant 0 : i32
    %c0_i32_0 = arith.constant 0 : i32
    return %arg0, %c0_i32 : i32, i32
  }
  func.func @transform_1(%arg0: i32) -> (i32, i32) {
    %c0_i32 = arith.constant 0 : i32
    %c0_i32_0 = arith.constant 0 : i32
    return %arg0, %c0_i32 : i32, i32
  }
  func.func @transform_2(%arg0: i32) -> (i32, i32) {
    %c0_i32 = arith.constant 0 : i32
    %c0_i32_0 = arith.constant 0 : i32
    %c0_i32_1 = arith.constant 0 : i32
    return %c0_i32, %c0_i32_0 : i32, i32
  }
  func.func @transform_3(%arg0: i32) -> (i32, i32) {
    %c0_i32 = arith.constant 0 : i32
    %c0_i32_0 = arith.constant 0 : i32
    return %arg0, %c0_i32 : i32, i32
  }
}

</mosaic_0001>

<bundles_post_ra>
// kernel: tpu_custom_call.1
= control target key start
LH: loop header
LB: loop body
LE: loop exit
PB: predicated region body
PF: predicated region fallthrough
CT: control target
= control target key end

     0   :  { %vm15_vm0 = vcmask 261120   ;;  %v89_v2 = vmov 0   ;;  %v28_v10 = vlaneseq  ;;  %vm60_vm2 = vcmask 7168   ;;  %s128_s0 = inlined_call_operand.vmem [shape: f32[8,32], index: 0, kind: input, shape index: {}]   ;;  %s129_s1 = inlined_call_operand.vmem [shape: s32[8,1], index: 1, kind: input, shape index: {}]   ;;  %s130_s2 = inlined_call_operand.vmem [shape: f32[1,32], index: 2, kind: input, shape index: {}]   ;;  %s131_s3 = inlined_call_operand.vmem [shape: f32[8,1], index: 3, kind: output, shape index: {}]  }
   0x1   :  { %v14_v0 = vld [vmem:[%s128_s0] sm:$0xff]  ;;  %83 = vset.pattern.permute.xlu1 %v89_v2  ;;  %84 = vset.pattern.permute.xlu0 %v89_v2 }
   0x2   :  { %v16_v1 = vsel %vm15_vm0, %v14_v0, -inf  ;;  %v27_v3 = vld [vmem:[%s129_s1] sm:$0xff]  ;;  %v29_v12 = vand.u32 127, %v28_v10  ;;  %v54_v34 = vshrl.u32 %v28_v10, 7 }
   0x3   :  { %17 = vmax.xlane.f32.xlu0 %v16_v1  ;;  %31 = vperm.xlu1 %83, %v27_v3   ;;  %v79_v15 = vld [vmem:[%s130_s2] ss:$0 sm:$0xff] }
   0x4   :  { %vm71_vm3 = vcmp.eq.s32.totalorder %v54_v34, 0 }
  0x7e   :  { %v32_v14 = vpop.permute.xlu1 %31 }
  0x7f   :  { %vm33_vm1 = vcmp.eq.s32.totalorder %v29_v12, %v32_v14 }
  0x8c   :  { %v18_v4 = vpop.xlane.xlu0 %17 }
  0x8d   :  { %v19_v5 = vsub.f32 %v14_v0, %v18_v4 }
  0x8f   :  { %v20_v6 = vmul.f32 1.442695, %v19_v5 }
  0x91   :  { %85 = vpow2.f32 %v20_v6 }
  0x9e   :  { %v86_v7 = vpop.eup %85 }
  0x9f   :  { %v22_v8 = vsel %vm15_vm0, %v86_v7, 0.0 }
  0xa0   :  { %23 = vadd.xlane.f32.xlu0 %v22_v8 }
 0x129   :  { %v24_v9 = vpop.xlane.xlu0 %23 }
 0x12a   :  { %87 = vlog2.f32 %v24_v9 }
 0x137   :  { %v88_v11 = vpop.eup %87 }
 0x138   :  { %v26_v13 = vmul.f32 0.6931472, %v88_v11 }
 0x13a   :  { %v35_v16 = vsub.f32 %v19_v5, %v26_v13 }
 0x13c   :  { %v42_v17 = vmul.f32 %v79_v15, %v35_v16 }
 0x13e   :  { %v43_v18 = vsel %vm15_vm0, %v42_v17, 0.0  ;;  %v46_v19 = vsel %vm33_vm1, %v42_v17, 0.0 }
 0x13f   :  { %44 = vadd.xlane.f32.xlu1 %v43_v18  ;;  %v47_v20 = vsel %vm15_vm0, %v46_v19, 0.0 }
 0x140   :  { %48 = vadd.xlane.f32.xlu0 %v47_v20 }
 0x1c8   :  { %v45_v21 = vpop.xlane.xlu1 %44 }
 0x1c9   :  { %v50_v22 = vmul.f32 0.0032258064, %v45_v21  ;;  %v49_v23 = vpop.xlane.xlu0 %48 }
 0x1ca   :  { %v51_v24 = vmul.f32 0.8967742, %v49_v23 }
 0x1cc   :  { %v52_v25 = vadd.f32 %v51_v24, %v50_v22 }
 0x1ce   :  { %v61_v26 = vsel %vm60_vm2, %v52_v25, 0.0 }
 0x1cf   :  { %62 = vadd.xlane.f32.xlu0 %v61_v26 }
 0x258   :  { %v63_v27 = vpop.xlane.xlu0 %62 }
 0x259   :  { %v64_v28 = vrot.slane %v63_v27, 4 }
 0x25b   :  { %v65_v29 = vadd.f32 %v64_v28, %v63_v27 }
 0x25d   :  { %v66_v30 = vrot.slane %v65_v29, 2 }
 0x25f   :  { %v67_v31 = vadd.f32 %v66_v30, %v65_v29 }
 0x261   :  { %v68_v32 = vrot.slane %v67_v31, 1 }
 0x263   :  { %v69_v33 = vadd.f32 %v68_v32, %v67_v31 }
 0x265   :  { %80 = vpush %v69_v33 }
 0x296   :  { %s81_s1 = spop %80 }
 0x297   :  { %v72_v35 = vstv %s81_s1 }
 0x298   :  { %v73_v36 = vsel %vm71_vm3, %v72_v35, 0.0 }
 0x299   :  { %74 = vst.msk [vmem:[%s131_s3] sm:$0xff] %vm60_vm2, %v73_v36 }

</bundles_post_ra>
